<compile_context>
chip_gen: v7x
topology: tpu7x:2x2x1
jax: 0.10.0
libtpu: 0.0.40
codegen_flags: <defaults>
</compile_context>

<pallas_src>
import jax
import jax.numpy as jnp
from jax.experimental import pallas as pl
from jax.experimental.pallas import tpu as pltpu

P_DROP = 0.2  # module default p


def _round_up(v, m):
    return ((v + m - 1) // m) * m


def _round_down(v, m):
    return max(m, (v // m) * m)


def _sublane_multiple(dtype):
    # min sublane tile: 8 for 4-byte, 16 for 2-byte, 32 for 1-byte dtypes
    return {4: 8, 2: 16, 1: 32}.get(jnp.dtype(dtype).itemsize, 8)


def _min_row_grid_steps():
    # v7x has 2 TensorCores per chip: make sure the row grid has enough steps
    # to shard across both cores and pipeline DMAs.  v5e/v6e are single-TC:
    # keep the biggest tile (fewest grid steps, least per-step overhead).
    try:
        kind = jax.devices()[0].device_kind.lower()
    except Exception:
        return 1
    return 8 if any(t in kind for t in ("v7", "tpu7", "7x")) else 1


def _mask_kernel(x_ref, m_ref, o_ref):
    # x_ref: (tn, fb) tile of node features; m_ref: (1, fb) int32 keep-mask.
    # jnp.where (not multiply): dropped columns become exactly 0 even if the
    # input held NaN/Inf there (PyTorch removes those columns entirely).
    x = x_ref[...]
    o_ref[...] = jnp.where(m_ref[...] != 0, x, jnp.zeros_like(x))


def _masked_call(x, mask, tn, fb, donate):
    n, f = x.shape
    itemsize = jnp.dtype(x.dtype).itemsize
    # Feature axis OUTER: the (1, fb) mask block index is constant across the
    # inner row loop, so its DMA is reused instead of re-issued every step.
    grid = (pl.cdiv(f, fb), pl.cdiv(n, tn))
    extra = {"input_output_aliases": {0: 0}} if donate else {}
    return pl.pallas_call(
        _mask_kernel,
        out_shape=jax.ShapeDtypeStruct((n, f), x.dtype),
        grid=grid,
        in_specs=[
            pl.BlockSpec((tn, fb), lambda j, i: (i, j)),   # node-row tile
            pl.BlockSpec((1, fb), lambda j, i: (0, j)),    # keep-mask row
        ],
        out_specs=pl.BlockSpec((tn, fb), lambda j, i: (i, j)),
        compiler_params=pltpu.CompilerParams(
            dimension_semantics=("parallel", "parallel"),
            vmem_limit_bytes=32 * 1024 * 1024),
        cost_estimate=pl.CostEstimate(
            flops=n * f,
            transcendentals=0,
            bytes_accessed=2 * n * f * itemsize + mask.size * 4),
        **extra,
    )(x, mask)


def _pick_tn(n_rows, fb, itemsize, sub, max_rows, budget, min_steps):
    tn = min(max_rows,
             _round_up(n_rows, sub),
             _round_down(budget // (fb * itemsize), sub))
    if min_steps > 1:
        # v7x: keep >= min_steps row-grid steps so both TensorCores are fed.
        tn = min(tn, _round_up(pl.cdiv(n_rows, min_steps), sub))
    return max(sub, tn)


def node_feature_mask(x, keep_mask, *, max_rows_per_tile=8192, donate=False):
    """Zero dropped feature columns of x ([N, F]) given keep_mask ([F] or [1, F])."""
    N, F = x.shape
    dtype = x.dtype
    keep_bool = jnp.asarray(keep_mask).reshape(1, F) != 0
    keep_i32 = keep_bool.astype(jnp.int32)      # int mask: robust for fp8 etc.
    sub = _sublane_multiple(dtype)
    itemsize = jnp.dtype(dtype).itemsize
    min_steps = _min_row_grid_steps()
    # ~4 MiB per tile; 2x in + 2x out double-buffered ~= 16 MiB, well inside
    # the 32 MiB vmem_limit_bytes passed above (v5e/v6e: 128 MiB physical
    # VMEM; v7x: 64 MiB per TensorCore -- 32 MiB scoped is safe everywhere).
    tile_budget = 4 * 1024 * 1024

    # Lane-dense fast path: fold features into full 128-lane rows so every
    # store is an unmasked full-width vst.  Works for any N: the few leftover
    # rows (< 128/F) are handled with plain jnp.where in the wrapper.
    if F <= 128 and 128 % F == 0:
        reps = 128 // F
        n_main = (N // reps) * reps
        parts = []
        if n_main > 0:
            rows = (n_main * F) // 128
            x2 = x[:n_main].reshape(rows, 128)
            m2 = jnp.tile(keep_i32, (1, reps))                  # (1, 128)
            tn = _pick_tn(rows, 128, itemsize, sub,
                          max_rows_per_tile, tile_budget, min_steps)
            parts.append(
                _masked_call(x2, m2, tn, 128, donate).reshape(n_main, F))
        if n_main < N:
            tail = x[n_main:]
            parts.append(jnp.where(keep_bool, tail, jnp.zeros_like(tail)))
        return parts[0] if len(parts) == 1 else jnp.concatenate(parts, axis=0)

    # General path (F > 128, or F <= 128 and not a divisor of 128): keep the
    # full feature width per tile (one contiguous DMA per row tile) unless a
    # full-width tile of `sub` rows would blow the budget; only then split the
    # feature axis into 128-multiple blocks.
    if F % 128 == 0 and F * itemsize * sub > tile_budget:
        fb = min(_round_down(tile_budget // (sub * itemsize), 128), F)
    else:
        fb = F
    tn = _pick_tn(N, fb, itemsize, sub, max_rows_per_tile, tile_budget, min_steps)
    return _masked_call(x, keep_i32, tn, fb, donate)


if __name__ == "__main__":
    key = jax.random.PRNGKey(0)
    keys = jax.random.split(key, 8)

    # Case 1: F divides 128, N a multiple of reps -> pure lane-dense fold.
    N, F = 64, 32
    x = jax.random.normal(keys[0], (N, F), dtype=jnp.float32)
    keep = jax.random.bernoulli(keys[1], 1.0 - P_DROP, (F,))
    out = jax.block_until_ready(node_feature_mask(x, keep))
    assert out.shape == (N, F)
    assert jnp.allclose(out, jnp.where(keep.reshape(1, F), x, 0.0)), "case 1"

    # Case 2: F divides 128 but ragged N -> folded main part + tiny tail.
    N2, F2 = 50, 32
    x2 = jax.random.normal(keys[2], (N2, F2), dtype=jnp.float32)
    keep2 = jax.random.bernoulli(keys[3], 1.0 - P_DROP, (F2,))
    out2 = jax.block_until_ready(node_feature_mask(x2, keep2))
    assert jnp.allclose(out2, jnp.where(keep2.reshape(1, F2), x2, 0.0)), "case 2"

    # Case 3: F multiple of 128 -> general path, full feature width per tile.
    N3, F3 = 48, 256
    x3 = jax.random.normal(keys[4], (N3, F3), dtype=jnp.float32)
    keep3 = jax.random.bernoulli(keys[5], 1.0 - P_DROP, (F3,))
    out3 = jax.block_until_ready(node_feature_mask(x3, keep3))
    assert jnp.allclose(out3, jnp.where(keep3.reshape(1, F3), x3, 0.0)), "case 3"

    # Case 4: odd F (no clean lane fold) -> full-width fallback (vst.msk stores
    # are unavoidable here since the mask pattern shifts per folded row).
    N4, F4 = 40, 100
    x4 = jax.random.normal(keys[6], (N4, F4), dtype=jnp.float32)
    keep4 = jax.random.bernoulli(keys[7], 1.0 - P_DROP, (F4,))
    out4 = jax.block_until_ready(node_feature_mask(x4, keep4))
    assert jnp.allclose(out4, jnp.where(keep4.reshape(1, F4), x4, 0.0)), "case 4"

    # TODO(synk): PyTorch boolean indexing removes dropped columns (dynamic
    # output shape); JAX needs static shapes, so dropped columns are zeroed.
    print("KERNEL_OK")
</pallas_src>

<mosaic_0001>
module attributes {stable_mosaic.version = 11 : i64} {
  func.func @_mask_kernel(%arg0: i32, %arg1: i32, %arg2: memref<16x128xf32, #tpu.memory_space<vmem>>, %arg3: memref<1x128xi32, #tpu.memory_space<vmem>>, %arg4: memref<16x128xf32, #tpu.memory_space<vmem>>) attributes {dimension_semantics = [#tpu.dimension_semantics<parallel>, #tpu.dimension_semantics<parallel>], iteration_bounds = array<i64: 1, 1>, scalar_prefetch = 0 : i64, scratch_operands = 0 : i64, tpu.core_type = #tpu.core_type<tc>, window_params = [{transform_indices = @transform_0, window_bounds = array<i64: 16, 128>}, {transform_indices = @transform_1, window_bounds = array<i64: 1, 128>}, {transform_indices = @transform_2, window_bounds = array<i64: 16, 128>}]} {
    %c0 = arith.constant 0 : index
    %c0_0 = arith.constant 0 : index
    %0 = vector.load %arg2[%c0, %c0_0] : memref<16x128xf32, #tpu.memory_space<vmem>>, vector<16x128xf32>
    %c0_1 = arith.constant 0 : index
    %c0_2 = arith.constant 0 : index
    %1 = vector.load %arg3[%c0_1, %c0_2] : memref<1x128xi32, #tpu.memory_space<vmem>>, vector<1x128xi32>
    %c0_i32 = arith.constant 0 : i32
    %2 = vector.broadcast %c0_i32 : i32 to vector<1x128xi32>
    %3 = arith.cmpi ne, %1, %2 : vector<1x128xi32>
    %cst = arith.constant 0.000000e+00 : f32
    %4 = vector.broadcast %cst : f32 to vector<16x128xf32>
    %5 = vector.shape_cast %3 : vector<1x128xi1> to vector<1x128xi1>
    %6 = vector.broadcast %5 : vector<1x128xi1> to vector<16x128xi1>
    %7 = arith.select %6, %0, %4 : vector<16x128xi1>, vector<16x128xf32>
    %c0_3 = arith.constant 0 : index
    %c0_4 = arith.constant 0 : index
    %8 = vector.load %arg4[%c0_3, %c0_4] : memref<16x128xf32, #tpu.memory_space<vmem>>, vector<16x128xf32>
    tpu.vector_store %arg4[%c0_3, %c0_4], %7 {strides = array<i32>} : memref<16x128xf32, #tpu.memory_space<vmem>>, vector<16x128xf32>,
    return
  }
  func.func @transform_0(%arg0: i32, %arg1: i32) -> (i32, i32) {
    %c0_i32 = arith.constant 0 : i32
    return %arg1, %arg0 : i32, i32
  }
  func.func @transform_1(%arg0: i32, %arg1: i32) -> (i32, i32) {
    %c0_i32 = arith.constant 0 : i32
    %c0_i32_0 = arith.constant 0 : i32
    return %c0_i32, %arg0 : i32, i32
  }
  func.func @transform_2(%arg0: i32, %arg1: i32) -> (i32, i32) {
    %c0_i32 = arith.constant 0 : i32
    return %arg1, %arg0 : i32, i32
  }
}

</mosaic_0001>

<bundles_post_ra>
// kernel: tpu_custom_call.1
= control target key start
LH: loop header
LB: loop body
LE: loop exit
PB: predicated region body
PF: predicated region fallthrough
CT: control target
= control target key end

     0   :  { %7 = vsyncpa [#allocation3], 0  ;;  %s163_s0 = inlined_call_operand.hbm [shape: f32[16,128], index: 0, kind: input, shape index: {}]   ;;  %s164_s1 = inlined_call_operand.vmem [shape: s32[1,128], index: 1, kind: input, shape index: {}]   ;;  %s165_s2 = inlined_call_operand.hbm [shape: f32[16,128], index: 2, kind: output, shape index: {}]  }
   0x1   :  { %8 = vsyncpa [#allocation4], 0  ;;  %s110_s9 = smov [#allocation2]   ;;  %s62_s13 = scalar_lea.hbm %s163_s0, 256 }
   0x2   :  { %s14_s10 = sshll.u32 %s110_s9, 4  ;;  %p63_p0 = scmp.ne.s32.totalorder %s163_s0, %s62_s13  ;;  %s15_s10 = int_to_ptr.vmem [resolvable:$true] %s14_s10 }
   0x3   :  { %p66_p1 = scmp.lt.u32.totalorder %s62_s13, %s163_s0 }
   0x5   :  { %p68_p2 = pnand %p66_p1, %p63_p0 }
   0x7   :  { %71 = shalt.err (!%p68_p2)
}
   0x8   :  { %s72_s18 = scalar_lea.vmem %s15_s10, 256  ;;  %p77_p4 = scmp.lt.s32.totalorder %s15_s10, %s15_s10 }
   0x9   :  { %p73_p3 = scmp.ne.s32.totalorder %s15_s10, %s72_s18  ;;  %p78_p5 = scmp.lt.s32.totalorder %s72_s18, %s72_s18 }
   0xb   :  { %p79_p6 = por %p78_p5, %p77_p4 }
   0xd   :  { %p80_p7 = pnand %p79_p6, %p73_p3 }
   0xf   :  { %83 = shalt.err (!%p80_p7)
}
  0x10   :  { %s111_s19 = smov 128   ;;  %s112_s20 = smov 8  }
  0x11   :  { %20 = dma.hbm_to_vmem [thread:$0]  %s163_s0, 256, %s15_s10, [#allocation3], %s111_s19, %s111_s19, %s112_s20  }
  0x12   :  { %106 = dma.done.wait [#allocation3], 256  }
  0x13   :  { %107 = vsyncadd [#allocation3], 4294967040  ;;  %v31_v0 = vlaneseq  ;;  %v28_v3 = vld [vmem:[%s164_s1] sm:$0x1]  ;;  %v113_v4 = vmov 0   ;;  %s114_s25 = smov [#allocation5]  }
  0x14   :  { %vm29_vm0 = vcmp.ne.s32.totalorder %v28_v3, 0  ;;  %s45_s26 = sshll.u32 %s114_s25, 4  ;;  %v26_v6 = vld [vmem:[#allocation2] sm:$0xff]  ;;  %v27_v8 = vld [vmem:[#allocation2 + $0x8] sm:$0xff]  ;;  %s46_s26 = int_to_ptr.vmem [resolvable:$true] %s45_s26 }
  0x15   :  { %v32_v1 = vshrl.u32 %v31_v0, 7  ;;  %v30_v5 = vsel %vm29_vm0, 1, %v113_v4  ;;  %s84_s0 = scalar_lea.vmem %s46_s26, 256  ;;  %p89_p9 = scmp.lt.s32.totalorder %s46_s26, %s46_s26 }
  0x16   :  { %p85_p8 = scmp.ne.s32.totalorder %s46_s26, %s84_s0  ;;  %p90_p10 = scmp.lt.s32.totalorder %s84_s0, %s84_s0 }
  0x17   :  { %v33_v2 = vsub.s32 0, %v32_v1 }
  0x18   :  { %p91_p11 = por %p90_p10, %p89_p9 }
  0x19   :  { %v34_v7 = vrot.slane %v30_v5, %v33_v2 }
  0x1a   :  { %p92_p12 = pnand %p91_p11, %p85_p8 }
  0x1b   :  { %vm35_vm1 = vcmp.eq.s32.totalorder %v34_v7, 1 }
  0x1c   :  { %v36_v9 = vsel %vm35_vm1, %v26_v6, 0.0  ;;  %v37_v10 = vsel %vm35_vm1, %v27_v8, 0.0 }
  0x1d   :  { %38 = vst [vmem:[#allocation5] sm:$0xff] %v36_v9  ;;  %39 = vst [vmem:[#allocation5 + $0x8] sm:$0xff] %v37_v10 }
  0x1e   :  { %95 = shalt.err (!%p92_p12)
}
  0x1f   :  { %s96_s28 = scalar_lea.hbm %s165_s2, 256 }
  0x20   :  { %p97_p13 = scmp.ne.s32.totalorder %s165_s2, %s96_s28  ;;  %p100_p0 = scmp.lt.u32.totalorder %s96_s28, %s165_s2 }
  0x22   :  { %p102_p1 = pnand %p100_p0, %p97_p13 }
  0x24   :  { %105 = shalt.err (!%p102_p1)
}
  0x25   :  { %51 = dma.vmem_to_hbm [thread:$0]  %s46_s26, 256, %s165_s2, [#allocation4], %s111_s19, %s111_s19, %s112_s20  }
  0x26   :  { %108 = dma.done.wait [#allocation4], 256  }
  0x27   :  { %109 = vsyncadd [#allocation4], 4294967040 }
  0x28   :  { %55 = vsyncpa [#allocation3], 1 }
  0x29   :  { %56 = vsyncpa [#allocation4], 1 }

</bundles_post_ra>
